<compile_context>
chip_gen: v7x
topology: tpu7x:2x2x1
jax: 0.10.0
libtpu: 0.0.40
codegen_flags: <defaults>
</compile_context>

<pallas_src>
import jax
import jax.numpy as jnp
from jax.experimental import pallas as pl
from jax.experimental.pallas import tpu as pltpu

_BN_EPS = 1e-5
_NORM_EPS_SQ = 1e-24  # F.normalize eps=1e-12 applied to the norm -> 1e-24 on sumsq


def _l2norm_rows(x):
    """F.normalize(x, dim=1): L2 over dim 1, denom clamped at 1e-12 (EUP rsqrt)."""
    sumsq = jnp.sum(x * x, axis=1, keepdims=True)
    return x * jax.lax.rsqrt(jnp.maximum(sumsq, _NORM_EPS_SQ))


def _geu_tail(h, w2, p):
    """Context_Gating (training-mode BN) + GLU + F.normalize, given h = fc(x).

    h : (B, D) f32, w2 : (D, D) bf16, p : (4, D) f32 rows = [b1, b2, gamma, beta].
    """
    b2, gamma, beta = p[1:2, :], p[2:3, :], p[3:4, :]
    x1 = jnp.dot(h.astype(jnp.bfloat16), w2,
                 preferred_element_type=jnp.float32) + b2
    # BatchNorm1d, training mode: batch mean, biased variance, eps=1e-5,
    # affine folded into one scale/shift FMA.
    mean = jnp.mean(x1, axis=0, keepdims=True)
    var = jnp.mean((x1 - mean) ** 2, axis=0, keepdims=True)
    scale = gamma * jax.lax.rsqrt(var + _BN_EPS)
    shift = beta - mean * scale
    x1n = x1 * scale + shift
    # glu(cat([h, x1n], 1), 1) == h * sigmoid(x1n)
    g = h * jax.nn.sigmoid(x1n)
    return _l2norm_rows(g)


def _make_net2_kernel(vis_dim, mot_dim, aud_dim):
    """Fused Net2.forward (conf=True) kernel factory (static modality splits)."""
    s1 = vis_dim
    s2 = vis_dim + mot_dim
    s3 = vis_dim + mot_dim + aud_dim

    def kernel(text_ref, vis_ref, mot_ref, aud_ref,
               w1t_ref, w2t_ref, pt_ref,
               w1v_ref, w2v_ref, pv_ref,
               o_ref):
        # ---------------- text GEU ----------------
        pt = pt_ref[...]
        h_t = jnp.dot(text_ref[...].astype(jnp.bfloat16), w1t_ref[...],
                      preferred_element_type=jnp.float32) + pt[0:1, :]
        t = _geu_tail(h_t, w2t_ref[...], pt)

        # -------- fused video preprocessing --------
        vis_n = _l2norm_rows(vis_ref[...])
        mot_n = _l2norm_rows(mot_ref[...])
        aud_n = _l2norm_rows(jnp.max(aud_ref[...], axis=1))

        # ---------------- video GEU ----------------
        # cat([vis,mot,aud], 1) @ W1.T  ==  sum of three sub-matmuls against
        # row-slices of the pre-transposed weight; avoids an in-kernel lane concat.
        pv = pv_ref[...]
        w1v = w1v_ref[...]
        h_v = (jnp.dot(vis_n.astype(jnp.bfloat16), w1v[0:s1, :],
                       preferred_element_type=jnp.float32)
               + jnp.dot(mot_n.astype(jnp.bfloat16), w1v[s1:s2, :],
                         preferred_element_type=jnp.float32)
               + jnp.dot(aud_n.astype(jnp.bfloat16), w1v[s2:s3, :],
                         preferred_element_type=jnp.float32)
               + pv[0:1, :])
        v = _geu_tail(h_v, w2v_ref[...], pv)

        # -------- similarity: t @ v.T (contract feature dim, no transpose) ----
        sim = jax.lax.dot_general(t, v, (((1,), (1,)), ((), ())),
                                  preferred_element_type=jnp.float32)
        # (B,B)=(8,8) store is a single masked vst — fine at this size.
        # TODO(synk): at production B pad the similarity to a lane-dense slab.
        o_ref[...] = sim.astype(o_ref.dtype)

    return kernel


def net2_forward(text_pooled, video, text_params, video_params):
    """Net2.forward (conf=True branch) as one fused Pallas call.

    TODO(synk): NetVLAD text/audio pooling is not defined in the provided spec;
    `text_pooled` is assumed to already be the pooled (B, text_pooled_dim) text.
    """
    w1t, w2t, pt = text_params
    w1v, w2v, pv = video_params
    visual, motion, audio = video["visual"], video["motion"], video["audio"]

    B, d_text = text_pooled.shape
    vis_dim = visual.shape[1]
    mot_dim = motion.shape[1]
    aud_T, aud_dim = audio.shape[1], audio.shape[2]

    kernel = _make_net2_kernel(vis_dim, mot_dim, aud_dim)

    def full(shape):
        return pl.BlockSpec(shape, lambda: (0,) * len(shape))

    return pl.pallas_call(
        kernel,
        out_shape=jax.ShapeDtypeStruct((B, B), jnp.float32),
        grid_spec=pltpu.PrefetchScalarGridSpec(
            num_scalar_prefetch=0,
            grid=(),
            in_specs=[
                full((B, d_text)),
                full((B, vis_dim)),
                full((B, mot_dim)),
                full((B, aud_T, aud_dim)),
                full(w1t.shape), full(w2t.shape), full(pt.shape),
                full(w1v.shape), full(w2v.shape), full(pv.shape),
            ],
            out_specs=full((B, B)),
        ),
    )(text_pooled, visual, motion, audio, w1t, w2t, pt, w1v, w2v, pv)


def net2_reference(text_pooled, video, text_params, video_params):
    """Pure-JAX reference in matching (bf16-matmul / f32-accumulate) precision."""
    def l2norm(x):
        n = jnp.maximum(jnp.sqrt(jnp.sum(x * x, axis=1, keepdims=True)), 1e-12)
        return x / n

    def geu(x, w1, w2, p):
        b1, b2, gamma, beta = (p[i:i + 1, :] for i in range(4))
        h = jnp.dot(x.astype(jnp.bfloat16), w1,
                    preferred_element_type=jnp.float32) + b1
        x1 = jnp.dot(h.astype(jnp.bfloat16), w2,
                     preferred_element_type=jnp.float32) + b2
        mean = jnp.mean(x1, axis=0, keepdims=True)
        var = jnp.mean((x1 - mean) ** 2, axis=0, keepdims=True)
        x1n = (x1 - mean) / jnp.sqrt(var + _BN_EPS) * gamma + beta
        g = h * jax.nn.sigmoid(x1n)
        return l2norm(g)

    w1t, w2t, pt = text_params
    w1v, w2v, pv = video_params
    vid = jnp.concatenate(
        [l2norm(video["visual"]),
         l2norm(video["motion"]),
         l2norm(jnp.max(video["audio"], axis=1))],
        axis=1,
    )
    t = geu(text_pooled, w1t, w2t, pt)
    v = geu(vid, w1v, w2v, pv)
    return jnp.matmul(t, v.T)


def make_geu_params(key, d_in, d_out):
    """PyTorch-like Linear init; fresh BatchNorm1d affine. Weights pre-transposed, bf16."""
    k1, k2, k3, k4 = jax.random.split(key, 4)
    lim1 = 1.0 / (d_in ** 0.5)
    w1 = jax.random.uniform(k1, (d_in, d_out), jnp.float32, -lim1, lim1)
    b1 = jax.random.uniform(k2, (1, d_out), jnp.float32, -lim1, lim1)
    lim2 = 1.0 / (d_out ** 0.5)
    w2 = jax.random.uniform(k3, (d_out, d_out), jnp.float32, -lim2, lim2)
    b2 = jax.random.uniform(k4, (1, d_out), jnp.float32, -lim2, lim2)
    gamma = jnp.ones((1, d_out), jnp.float32)
    beta = jnp.zeros((1, d_out), jnp.float32)
    params = jnp.concatenate([b1, b2, gamma, beta], axis=0)  # (4, d_out)
    return w1.astype(jnp.bfloat16), w2.astype(jnp.bfloat16), params


if __name__ == "__main__":
    B = 8
    embd_dim = 128                 # D_out of both GEUs
    text_pooled_dim = 64           # stands in for NetVLAD(text).out_dim
    vis_dim, mot_dim, aud_dim, aud_T = 48, 48, 32, 8
    video_modality_dim = vis_dim + mot_dim + aud_dim   # 128

    key = jax.random.PRNGKey(0)
    k_text, k_vis, k_mot, k_aud, k_pt, k_pv = jax.random.split(key, 6)

    text_pooled = jax.random.normal(k_text, (B, text_pooled_dim), jnp.float32)
    video = {
        "visual": jax.random.normal(k_vis, (B, vis_dim), jnp.float32),
        "motion": jax.random.normal(k_mot, (B, mot_dim), jnp.float32),
        "audio": jax.random.normal(k_aud, (B, aud_T, aud_dim), jnp.float32),
    }
    text_params = make_geu_params(k_pt, text_pooled_dim, embd_dim)
    video_params = make_geu_params(k_pv, video_modality_dim, embd_dim)

    # Fused Net2 forward (conf=True): preprocessing + both GEUs + t @ v.T in
    # a single pallas_call.
    sim = jax.block_until_ready(
        net2_forward(text_pooled, video, text_params, video_params)
    )
    ref = net2_reference(text_pooled, video, text_params, video_params)

    assert sim.shape == (B, B)
    assert bool(jnp.all(jnp.isfinite(sim)))
    assert jnp.allclose(sim, ref, atol=5e-3, rtol=5e-3), "mismatch vs JAX reference"

    print("KERNEL_OK")
</pallas_src>

<mosaic_0001>
module attributes {stable_mosaic.version = 11 : i64} {
  func.func @kernel(%arg0: memref<8x64xf32, #tpu.memory_space<vmem>>, %arg1: memref<8x48xf32, #tpu.memory_space<vmem>>, %arg2: memref<8x48xf32, #tpu.memory_space<vmem>>, %arg3: memref<8x8x32xf32, #tpu.memory_space<vmem>>, %arg4: memref<64x128xbf16, #tpu.memory_space<vmem>>, %arg5: memref<128x128xbf16, #tpu.memory_space<vmem>>, %arg6: memref<4x128xf32, #tpu.memory_space<vmem>>, %arg7: memref<128x128xbf16, #tpu.memory_space<vmem>>, %arg8: memref<128x128xbf16, #tpu.memory_space<vmem>>, %arg9: memref<4x128xf32, #tpu.memory_space<vmem>>, %arg10: memref<8x8xf32, #tpu.memory_space<vmem>>) attributes {dimension_semantics = [], scalar_prefetch = 0 : i64, scratch_operands = 0 : i64, tpu.core_type = #tpu.core_type<tc>} {
    %c0 = arith.constant 0 : index
    %c0_0 = arith.constant 0 : index
    %0 = vector.load %arg6[%c0, %c0_0] : memref<4x128xf32, #tpu.memory_space<vmem>>, vector<4x128xf32>
    %c0_1 = arith.constant 0 : index
    %c0_2 = arith.constant 0 : index
    %1 = vector.load %arg0[%c0_1, %c0_2] : memref<8x64xf32, #tpu.memory_space<vmem>>, vector<8x64xf32>
    %2 = arith.truncf %1 : vector<8x64xf32> to vector<8x64xbf16>
    %c0_3 = arith.constant 0 : index
    %c0_4 = arith.constant 0 : index
    %3 = vector.load %arg4[%c0_3, %c0_4] : memref<64x128xbf16, #tpu.memory_space<vmem>>, vector<64x128xbf16>
    %cst = arith.constant dense<0.000000e+00> : vector<8x128xf32>
    %4 = tpu.matmul %2, %3, %cst {dimension_numbers = #tpu.dot_dimension_numbers<[1], [0], [0], [1], [0, 0, 1, 1], [], []>} : vector<8x64xbf16>, vector<64x128xbf16>, vector<8x128xf32> -> vector<8x128xf32>
    %5 = vector.extract_strided_slice %0 {offsets = [0, 0], sizes = [1, 128], strides = [1, 1]} : vector<4x128xf32> to vector<1x128xf32>
    %6 = vector.broadcast %5 : vector<1x128xf32> to vector<8x128xf32>
    %7 = arith.addf %4, %6 : vector<8x128xf32>
    %c0_5 = arith.constant 0 : index
    %c0_6 = arith.constant 0 : index
    %8 = vector.load %arg5[%c0_5, %c0_6] : memref<128x128xbf16, #tpu.memory_space<vmem>>, vector<128x128xbf16>
    %9 = vector.extract_strided_slice %0 {offsets = [1, 0], sizes = [1, 128], strides = [1, 1]} : vector<4x128xf32> to vector<1x128xf32>
    %10 = vector.extract_strided_slice %0 {offsets = [2, 0], sizes = [1, 128], strides = [1, 1]} : vector<4x128xf32> to vector<1x128xf32>
    %11 = vector.extract_strided_slice %0 {offsets = [3, 0], sizes = [1, 128], strides = [1, 1]} : vector<4x128xf32> to vector<1x128xf32>
    %12 = arith.truncf %7 : vector<8x128xf32> to vector<8x128xbf16>
    %cst_7 = arith.constant dense<0.000000e+00> : vector<8x128xf32>
    %13 = tpu.matmul %12, %8, %cst_7 {dimension_numbers = #tpu.dot_dimension_numbers<[1], [0], [0], [1], [0, 0, 1, 1], [], []>} : vector<8x128xbf16>, vector<128x128xbf16>, vector<8x128xf32> -> vector<8x128xf32>
    %14 = vector.broadcast %9 : vector<1x128xf32> to vector<8x128xf32>
    %15 = arith.addf %13, %14 : vector<8x128xf32>
    %cst_8 = arith.constant dense<0.000000e+00> : vector<128xf32>
    %16 = vector.multi_reduction <add>, %15, %cst_8 [0] : vector<8x128xf32> to vector<128xf32>
    %17 = vector.shape_cast %16 : vector<128xf32> to vector<1x128xf32>
    %cst_9 = arith.constant 8.000000e+00 : f32
    %18 = vector.broadcast %cst_9 : f32 to vector<1x128xf32>
    %19 = arith.divf %17, %18 : vector<1x128xf32>
    %20 = vector.broadcast %19 : vector<1x128xf32> to vector<8x128xf32>
    %21 = arith.subf %15, %20 : vector<8x128xf32>
    %22 = arith.mulf %21, %21 : vector<8x128xf32>
    %cst_10 = arith.constant dense<0.000000e+00> : vector<128xf32>
    %23 = vector.multi_reduction <add>, %22, %cst_10 [0] : vector<8x128xf32> to vector<128xf32>
    %24 = vector.shape_cast %23 : vector<128xf32> to vector<1x128xf32>
    %cst_11 = arith.constant 8.000000e+00 : f32
    %25 = vector.broadcast %cst_11 : f32 to vector<1x128xf32>
    %26 = arith.divf %24, %25 : vector<1x128xf32>
    %cst_12 = arith.constant 9.99999974E-6 : f32
    %27 = vector.broadcast %cst_12 : f32 to vector<1x128xf32>
    %28 = arith.addf %26, %27 : vector<1x128xf32>
    %29 = math.rsqrt %28 : vector<1x128xf32>
    %30 = arith.mulf %10, %29 : vector<1x128xf32>
    %31 = arith.mulf %19, %30 : vector<1x128xf32>
    %32 = arith.subf %11, %31 : vector<1x128xf32>
    %33 = vector.broadcast %30 : vector<1x128xf32> to vector<8x128xf32>
    %34 = arith.mulf %15, %33 : vector<8x128xf32>
    %35 = vector.broadcast %32 : vector<1x128xf32> to vector<8x128xf32>
    %36 = arith.addf %34, %35 : vector<8x128xf32>
    %37 = arith.negf %36 : vector<8x128xf32>
    %38 = math.exp %37 : vector<8x128xf32>
    %cst_13 = arith.constant 1.000000e+00 : f32
    %39 = vector.broadcast %cst_13 : f32 to vector<8x128xf32>
    %40 = arith.addf %39, %38 : vector<8x128xf32>
    %41 = arith.divf %39, %40 : vector<8x128xf32>
    %42 = arith.mulf %7, %41 : vector<8x128xf32>
    %43 = arith.mulf %42, %42 : vector<8x128xf32>
    %cst_14 = arith.constant dense<0.000000e+00> : vector<8xf32>
    %44 = vector.multi_reduction <add>, %43, %cst_14 [1] : vector<8x128xf32> to vector<8xf32>
    %45 = vector.shape_cast %44 : vector<8xf32> to vector<8x1xf32>
    %cst_15 = arith.constant 1.000000e-24 : f32
    %46 = vector.broadcast %cst_15 : f32 to vector<8x1xf32>
    %47 = arith.maximumf %45, %46 : vector<8x1xf32>
    %48 = math.rsqrt %47 : vector<8x1xf32>
    %49 = vector.broadcast %48 : vector<8x1xf32> to vector<8x128xf32>
    %50 = arith.mulf %42, %49 : vector<8x128xf32>
    %c0_16 = arith.constant 0 : index
    %c0_17 = arith.constant 0 : index
    %51 = vector.load %arg1[%c0_16, %c0_17] : memref<8x48xf32, #tpu.memory_space<vmem>>, vector<8x48xf32>
    %52 = arith.mulf %51, %51 : vector<8x48xf32>
    %cst_18 = arith.constant dense<0.000000e+00> : vector<8xf32>
    %53 = vector.multi_reduction <add>, %52, %cst_18 [1] : vector<8x48xf32> to vector<8xf32>
    %54 = vector.shape_cast %53 : vector<8xf32> to vector<8x1xf32>
    %cst_19 = arith.constant 1.000000e-24 : f32
    %55 = vector.broadcast %cst_19 : f32 to vector<8x1xf32>
    %56 = arith.maximumf %54, %55 : vector<8x1xf32>
    %57 = math.rsqrt %56 : vector<8x1xf32>
    %58 = vector.broadcast %57 : vector<8x1xf32> to vector<8x48xf32>
    %59 = arith.mulf %51, %58 : vector<8x48xf32>
    %c0_20 = arith.constant 0 : index
    %c0_21 = arith.constant 0 : index
    %60 = vector.load %arg2[%c0_20, %c0_21] : memref<8x48xf32, #tpu.memory_space<vmem>>, vector<8x48xf32>
    %61 = arith.mulf %60, %60 : vector<8x48xf32>
    %cst_22 = arith.constant dense<0.000000e+00> : vector<8xf32>
    %62 = vector.multi_reduction <add>, %61, %cst_22 [1] : vector<8x48xf32> to vector<8xf32>
    %63 = vector.shape_cast %62 : vector<8xf32> to vector<8x1xf32>
    %cst_23 = arith.constant 1.000000e-24 : f32
    %64 = vector.broadcast %cst_23 : f32 to vector<8x1xf32>
    %65 = arith.maximumf %63, %64 : vector<8x1xf32>
    %66 = math.rsqrt %65 : vector<8x1xf32>
    %67 = vector.broadcast %66 : vector<8x1xf32> to vector<8x48xf32>
    %68 = arith.mulf %60, %67 : vector<8x48xf32>
    %c0_24 = arith.constant 0 : index
    %c0_25 = arith.constant 0 : index
    %c0_26 = arith.constant 0 : index
    %69 = vector.load %arg3[%c0_24, %c0_25, %c0_26] : memref<8x8x32xf32, #tpu.memory_space<vmem>>, vector<8x8x32xf32>
    %cst_27 = arith.constant dense<0xFF800000> : vector<8x32xf32>
    %70 = vector.multi_reduction <maximumf>, %69, %cst_27 [1] : vector<8x8x32xf32> to vector<8x32xf32>
    %71 = arith.mulf %70, %70 : vector<8x32xf32>
    %cst_28 = arith.constant dense<0.000000e+00> : vector<8xf32>
    %72 = vector.multi_reduction <add>, %71, %cst_28 [1] : vector<8x32xf32> to vector<8xf32>
    %73 = vector.shape_cast %72 : vector<8xf32> to vector<8x1xf32>
    %cst_29 = arith.constant 1.000000e-24 : f32
    %74 = vector.broadcast %cst_29 : f32 to vector<8x1xf32>
    %75 = arith.maximumf %73, %74 : vector<8x1xf32>
    %76 = math.rsqrt %75 : vector<8x1xf32>
    %77 = vector.broadcast %76 : vector<8x1xf32> to vector<8x32xf32>
    %78 = arith.mulf %70, %77 : vector<8x32xf32>
    %c0_30 = arith.constant 0 : index
    %c0_31 = arith.constant 0 : index
    %79 = vector.load %arg9[%c0_30, %c0_31] : memref<4x128xf32, #tpu.memory_space<vmem>>, vector<4x128xf32>
    %c0_32 = arith.constant 0 : index
    %c0_33 = arith.constant 0 : index
    %80 = vector.load %arg7[%c0_32, %c0_33] : memref<128x128xbf16, #tpu.memory_space<vmem>>, vector<128x128xbf16>
    %81 = arith.truncf %59 : vector<8x48xf32> to vector<8x48xbf16>
    %82 = vector.extract_strided_slice %80 {offsets = [0, 0], sizes = [48, 128], strides = [1, 1]} : vector<128x128xbf16> to vector<48x128xbf16>
    %cst_34 = arith.constant dense<0.000000e+00> : vector<8x128xf32>
    %83 = tpu.matmul %81, %82, %cst_34 {dimension_numbers = #tpu.dot_dimension_numbers<[1], [0], [0], [1], [0, 0, 1, 1], [], []>} : vector<8x48xbf16>, vector<48x128xbf16>, vector<8x128xf32> -> vector<8x128xf32>
    %84 = arith.truncf %68 : vector<8x48xf32> to vector<8x48xbf16>
    %85 = vector.extract_strided_slice %80 {offsets = [48, 0], sizes = [48, 128], strides = [1, 1]} : vector<128x128xbf16> to vector<48x128xbf16>
    %cst_35 = arith.constant dense<0.000000e+00> : vector<8x128xf32>
    %86 = tpu.matmul %84, %85, %cst_35 {dimension_numbers = #tpu.dot_dimension_numbers<[1], [0], [0], [1], [0, 0, 1, 1], [], []>} : vector<8x48xbf16>, vector<48x128xbf16>, vector<8x128xf32> -> vector<8x128xf32>
    %87 = arith.addf %83, %86 : vector<8x128xf32>
    %88 = arith.truncf %78 : vector<8x32xf32> to vector<8x32xbf16>
    %89 = vector.extract_strided_slice %80 {offsets = [96, 0], sizes = [32, 128], strides = [1, 1]} : vector<128x128xbf16> to vector<32x128xbf16>
    %cst_36 = arith.constant dense<0.000000e+00> : vector<8x128xf32>
    %90 = tpu.matmul %88, %89, %cst_36 {dimension_numbers = #tpu.dot_dimension_numbers<[1], [0], [0], [1], [0, 0, 1, 1], [], []>} : vector<8x32xbf16>, vector<32x128xbf16>, vector<8x128xf32> -> vector<8x128xf32>
    %91 = arith.addf %87, %90 : vector<8x128xf32>
    %92 = vector.extract_strided_slice %79 {offsets = [0, 0], sizes = [1, 128], strides = [1, 1]} : vector<4x128xf32> to vector<1x128xf32>
    %93 = vector.broadcast %92 : vector<1x128xf32> to vector<8x128xf32>
    %94 = arith.addf %91, %93 : vector<8x128xf32>
    %c0_37 = arith.constant 0 : index
    %c0_38 = arith.constant 0 : index
    %95 = vector.load %arg8[%c0_37, %c0_38] : memref<128x128xbf16, #tpu.memory_space<vmem>>, vector<128x128xbf16>
    %96 = vector.extract_strided_slice %79 {offsets = [1, 0], sizes = [1, 128], strides = [1, 1]} : vector<4x128xf32> to vector<1x128xf32>
    %97 = vector.extract_strided_slice %79 {offsets = [2, 0], sizes = [1, 128], strides = [1, 1]} : vector<4x128xf32> to vector<1x128xf32>
    %98 = vector.extract_strided_slice %79 {offsets = [3, 0], sizes = [1, 128], strides = [1, 1]} : vector<4x128xf32> to vector<1x128xf32>
    %99 = arith.truncf %94 : vector<8x128xf32> to vector<8x128xbf16>
    %cst_39 = arith.constant dense<0.000000e+00> : vector<8x128xf32>
    %100 = tpu.matmul %99, %95, %cst_39 {dimension_numbers = #tpu.dot_dimension_numbers<[1], [0], [0], [1], [0, 0, 1, 1], [], []>} : vector<8x128xbf16>, vector<128x128xbf16>, vector<8x128xf32> -> vector<8x128xf32>
    %101 = vector.broadcast %96 : vector<1x128xf32> to vector<8x128xf32>
    %102 = arith.addf %100, %101 : vector<8x128xf32>
    %cst_40 = arith.constant dense<0.000000e+00> : vector<128xf32>
    %103 = vector.multi_reduction <add>, %102, %cst_40 [0] : vector<8x128xf32> to vector<128xf32>
    %104 = vector.shape_cast %103 : vector<128xf32> to vector<1x128xf32>
    %cst_41 = arith.constant 8.000000e+00 : f32
    %105 = vector.broadcast %cst_41 : f32 to vector<1x128xf32>
    %106 = arith.divf %104, %105 : vector<1x128xf32>
    %107 = vector.broadcast %106 : vector<1x128xf32> to vector<8x128xf32>
    %108 = arith.subf %102, %107 : vector<8x128xf32>
    %109 = arith.mulf %108, %108 : vector<8x128xf32>
    %cst_42 = arith.constant dense<0.000000e+00> : vector<128xf32>
    %110 = vector.multi_reduction <add>, %109, %cst_42 [0] : vector<8x128xf32> to vector<128xf32>
    %111 = vector.shape_cast %110 : vector<128xf32> to vector<1x128xf32>
    %cst_43 = arith.constant 8.000000e+00 : f32
    %112 = vector.broadcast %cst_43 : f32 to vector<1x128xf32>
    %113 = arith.divf %111, %112 : vector<1x128xf32>
    %cst_44 = arith.constant 9.99999974E-6 : f32
    %114 = vector.broadcast %cst_44 : f32 to vector<1x128xf32>
    %115 = arith.addf %113, %114 : vector<1x128xf32>
    %116 = math.rsqrt %115 : vector<1x128xf32>
    %117 = arith.mulf %97, %116 : vector<1x128xf32>
    %118 = arith.mulf %106, %117 : vector<1x128xf32>
    %119 = arith.subf %98, %118 : vector<1x128xf32>
    %120 = vector.broadcast %117 : vector<1x128xf32> to vector<8x128xf32>
    %121 = arith.mulf %102, %120 : vector<8x128xf32>
    %122 = vector.broadcast %119 : vector<1x128xf32> to vector<8x128xf32>
    %123 = arith.addf %121, %122 : vector<8x128xf32>
    %124 = arith.negf %123 : vector<8x128xf32>
    %125 = math.exp %124 : vector<8x128xf32>
    %cst_45 = arith.constant 1.000000e+00 : f32
    %126 = vector.broadcast %cst_45 : f32 to vector<8x128xf32>
    %127 = arith.addf %126, %125 : vector<8x128xf32>
    %128 = arith.divf %126, %127 : vector<8x128xf32>
    %129 = arith.mulf %94, %128 : vector<8x128xf32>
    %130 = arith.mulf %129, %129 : vector<8x128xf32>
    %cst_46 = arith.constant dense<0.000000e+00> : vector<8xf32>
    %131 = vector.multi_reduction <add>, %130, %cst_46 [1] : vector<8x128xf32> to vector<8xf32>
    %132 = vector.shape_cast %131 : vector<8xf32> to vector<8x1xf32>
    %cst_47 = arith.constant 1.000000e-24 : f32
    %133 = vector.broadcast %cst_47 : f32 to vector<8x1xf32>
    %134 = arith.maximumf %132, %133 : vector<8x1xf32>
    %135 = math.rsqrt %134 : vector<8x1xf32>
    %136 = vector.broadcast %135 : vector<8x1xf32> to vector<8x128xf32>
    %137 = arith.mulf %129, %136 : vector<8x128xf32>
    %cst_48 = arith.constant dense<0.000000e+00> : vector<8x8xf32>
    %138 = tpu.matmul %50, %137, %cst_48 {dimension_numbers = #tpu.dot_dimension_numbers<[1], [1], [0], [0], [0, 0, 1, 0], [], []>} : vector<8x128xf32>, vector<8x128xf32>, vector<8x8xf32> -> vector<8x8xf32>
    %c0_49 = arith.constant 0 : index
    %c0_50 = arith.constant 0 : index
    %139 = vector.load %arg10[%c0_49, %c0_50] : memref<8x8xf32, #tpu.memory_space<vmem>>, vector<8x8xf32>
    tpu.vector_store %arg10[%c0_49, %c0_50], %138 {strides = array<i32>} : memref<8x8xf32, #tpu.memory_space<vmem>>, vector<8x8xf32>,
    return
  }
}

</mosaic_0001>

<bundles_post_ra>
// kernel: tpu_custom_call.1
= control target key start
LH: loop header
LB: loop body
LE: loop exit
PB: predicated region body
PF: predicated region fallthrough
CT: control target
= control target key end

     0   :  { %15 = vsyncpa [#allocation3], 0  ;;  %s1810_s0 = inlined_call_operand.hbm [shape: f32[8,64], index: 0, kind: input, shape index: {}]   ;;  %s1811_s1 = inlined_call_operand.hbm [shape: f32[8,48], index: 1, kind: input, shape index: {}]   ;;  %s1812_s2 = inlined_call_operand.hbm [shape: f32[8,48], index: 2, kind: input, shape index: {}]   ;;  %s1813_s3 = inlined_call_operand.hbm [shape: f32[8,8,32], index: 3, kind: input, shape index: {}]   ;;  %s1814_s4 = inlined_call_operand.hbm [shape: bf16[64,128], index: 4, kind: input, shape index: {}]   ;;  %s1815_s5 = inlined_call_operand.hbm [shape: bf16[128,128], index: 5, kind: input, shape index: {}]   ;;  %s1816_s6 = inlined_call_operand.vmem [shape: f32[4,128], index: 6, kind: input, shape index: {}]   ;;  %s1817_s7 = inlined_call_operand.hbm [shape: bf16[128,128], index: 7, kind: input, shape index: {}]   ;;  %s1818_s8 = inlined_call_operand.hbm [shape: bf16[128,128], index: 8, kind: input, shape index: {}]   ;;  %s1819_s9 = inlined_call_operand.vmem [shape: f32[4,128], index: 9, kind: input, shape index: {}]   ;;  %s1820_s10 = inlined_call_operand.hbm [shape: f32[8,8], index: 10, kind: output, shape index: {}]  }
   0x1   :  { %16 = vsyncpa [#allocation6], 0 }
   0x2   :  { %17 = vsyncpa [#allocation9], 0 }
   0x3   :  { %18 = vsyncpa [#allocation12], 0 }
   0x4   :  { %19 = vsyncpa [#allocation15], 0 }
   0x5   :  { %20 = vsyncpa [#allocation4], 0  ;;  %s1440_s13 = smov [#allocation5]   ;;  %s1441_s15 = smov [#allocation8]  }
   0x6   :  { %s37_s14 = sshll.u32 %s1440_s13, 4  ;;  %s56_s16 = sshll.u32 %s1441_s15, 4  ;;  %s38_s14 = int_to_ptr.vmem [resolvable:$true] %s37_s14  ;;  %s1510_s16 = int_to_ptr.vmem [resolvable:$true] %s56_s16 }
   0x7   :  { %s1230_s19 = scalar_lea.hbm %s1811_s1, 128 }
   0x8   :  { %p1231_p0 = scmp.ne.s32.totalorder %s1811_s1, %s1230_s19  ;;  %p1234_p1 = scmp.lt.u32.totalorder %s1230_s19, %s1811_s1 }
   0xa   :  { %p1236_p2 = pnand %p1234_p1, %p1231_p0 }
   0xc   :  { %1239 = shalt.err (!%p1236_p2)
}
   0xd   :  { %s1240_s24 = scalar_lea.vmem %s38_s14, 128  ;;  %p1245_p4 = scmp.lt.s32.totalorder %s38_s14, %s38_s14 }
   0xe   :  { %p1241_p3 = scmp.ne.s32.totalorder %s38_s14, %s1240_s24  ;;  %p1246_p5 = scmp.lt.s32.totalorder %s1240_s24, %s1240_s24 }
  0x10   :  { %p1247_p6 = por %p1246_p5, %p1245_p4 }
  0x12   :  { %p1248_p7 = pnand %p1247_p6, %p1241_p3 }
  0x14   :  { %1251 = shalt.err (!%p1248_p7)
}
  0x15   :  { %40 = dma.hbm_to_vmem [thread:$0]  %s1811_s1, 128, %s38_s14, [#allocation6]  }
  0x16   :  { %s1252_s29 = scalar_lea.hbm %s1813_s3, 1024 }
  0x17   :  { %p1253_p8 = scmp.ne.s32.totalorder %s1813_s3, %s1252_s29  ;;  %p1256_p9 = scmp.lt.u32.totalorder %s1252_s29, %s1813_s3 }
  0x19   :  { %p1258_p10 = pnand %p1256_p9, %p1253_p8 }
  0x1b   :  { %1261 = shalt.err (!%p1258_p10)
}
  0x1c   :  { %s1262_s15 = scalar_lea.vmem %s1510_s16, 1024  ;;  %p1267_p12 = scmp.lt.s32.totalorder %s1510_s16, %s1510_s16 }
  0x1d   :  { %p1263_p11 = scmp.ne.s32.totalorder %s1510_s16, %s1262_s15  ;;  %p1268_p13 = scmp.lt.s32.totalorder %s1262_s15, %s1262_s15 }
  0x1f   :  { %p1269_p0 = por %p1268_p13, %p1267_p12 }
  0x21   :  { %p1270_p1 = pnand %p1269_p0, %p1263_p11 }
  0x23   :  { %1273 = shalt.err (!%p1270_p1)
}
  0x24   :  { %s1442_s1 = smov 128   ;;  %s1443_s14 = smov 8  }
  0x25   :  { %62 = dma.hbm_to_vmem [thread:$0]  %s1813_s3, 1024, %s1510_s16, [#allocation9], %s1442_s1, %s1442_s1, %s1443_s14  }
  0x26   :  { %s1444_s19 = smov [#allocation11]   ;;  %s1445_s21 = smov [#allocation2]  }
  0x27   :  { %s80_s20 = sshll.u32 %s1444_s19, 4  ;;  %s27_s22 = sshll.u32 %s1445_s21, 4  ;;  %s81_s20 = int_to_ptr.vmem [resolvable:$true] %s80_s20  ;;  %s28_s22 = int_to_ptr.vmem [resolvable:$true] %s27_s22 }
  0x28   :  { %s1274_s25 = scalar_lea.hbm %s1815_s5, 1024 }
  0x29   :  { %p1275_p2 = scmp.ne.s32.totalorder %s1815_s5, %s1274_s25  ;;  %p1278_p3 = scmp.lt.u32.totalorder %s1274_s25, %s1815_s5 }
  0x2b   :  { %p1280_p4 = pnand %p1278_p3, %p1275_p2 }
  0x2d   :  { %1283 = shalt.err (!%p1280_p4)
}
  0x2e   :  { %s1284_s3 = scalar_lea.vmem %s81_s20, 1024  ;;  %p1289_p6 = scmp.lt.s32.totalorder %s81_s20, %s81_s20 }
  0x2f   :  { %p1285_p5 = scmp.ne.s32.totalorder %s81_s20, %s1284_s3  ;;  %p1290_p7 = scmp.lt.s32.totalorder %s1284_s3, %s1284_s3 }
  0x31   :  { %p1291_p8 = por %p1290_p7, %p1289_p6 }
  0x33   :  { %p1292_p9 = pnand %p1291_p8, %p1285_p5 }
  0x35   :  { %1295 = shalt.err (!%p1292_p9)
}
  0x36   :  { %s1446_s16 = smov 64   ;;  %s1447_s30 = smov 4  }
  0x37   :  { %86 = dma.hbm_to_vmem [thread:$0]  %s1815_s5, 1024, %s81_s20, [#allocation12], %s1446_s16, %s1446_s16, %s1447_s30  }
  0x38   :  { %s1296_s1 = scalar_lea.hbm %s1810_s0, 128 }
  0x39   :  { %p1297_p10 = scmp.ne.s32.totalorder %s1810_s0, %s1296_s1  ;;  %p1300_p11 = scmp.lt.u32.totalorder %s1296_s1, %s1810_s0 }
  0x3b   :  { %p1302_p12 = pnand %p1300_p11, %p1297_p10 }
  0x3d   :  { %1305 = shalt.err (!%p1302_p12)
}
  0x3e   :  { %s1306_s21 = scalar_lea.vmem %s28_s22, 128  ;;  %p1311_p0 = scmp.lt.s32.totalorder %s28_s22, %s28_s22 }
  0x3f   :  { %p1307_p13 = scmp.ne.s32.totalorder %s28_s22, %s1306_s21  ;;  %p1312_p1 = scmp.lt.s32.totalorder %s1306_s21, %s1306_s21 }
  0x41   :  { %p1313_p2 = por %p1312_p1, %p1311_p0 }
  0x43   :  { %p1314_p3 = pnand %p1313_p2, %p1307_p13 }
  0x45   :  { %1317 = shalt.err (!%p1314_p3)
}
  0x46   :  { %30 = dma.hbm_to_vmem [thread:$0]  %s1810_s0, 128, %s28_s22, [#allocation3]  }
  0x47   :  { %s1448_s23 = smov [#allocation7]   ;;  %s1449_s25 = smov [#allocation10]  }
  0x48   :  { %s47_s24 = sshll.u32 %s1448_s23, 4  ;;  %s68_s26 = sshll.u32 %s1449_s25, 4  ;;  %s48_s24 = int_to_ptr.vmem [resolvable:$true] %s47_s24  ;;  %s1568_s26 = int_to_ptr.vmem [resolvable:$true] %s68_s26 }
  0x49   :  { %s1318_s29 = scalar_lea.hbm %s1812_s2, 128 }
  0x4a   :  { %p1319_p4 = scmp.ne.s32.totalorder %s1812_s2, %s1318_s29  ;;  %p1322_p5 = scmp.lt.u32.totalorder %s1318_s29, %s1812_s2 }
  0x4c   :  { %p1324_p6 = pnand %p1322_p5, %p1319_p4 }
  0x4e   :  { %1327 = shalt.err (!%p1324_p6)
}
  0x4f   :  { %s1328_s0 = scalar_lea.vmem %s48_s24, 128  ;;  %p1333_p8 = scmp.lt.s32.totalorder %s48_s24, %s48_s24 }
  0x50   :  { %p1329_p7 = scmp.ne.s32.totalorder %s48_s24, %s1328_s0  ;;  %p1334_p9 = scmp.lt.s32.totalorder %s1328_s0, %s1328_s0 }
  0x52   :  { %p1335_p10 = por %p1334_p9, %p1333_p8 }
  0x54   :  { %p1336_p11 = pnand %p1335_p10, %p1329_p7 }
  0x56   :  { %1339 = shalt.err (!%p1336_p11)
}
  0x57   :  { %50 = dma.hbm_to_vmem [thread:$0]  %s1812_s2, 128, %s48_s24, [#allocation6]  }
  0x58   :  { %s1340_s17 = scalar_lea.hbm %s1814_s4, 512 }
  0x59   :  { %p1341_p12 = scmp.ne.s32.totalorder %s1814_s4, %s1340_s17  ;;  %p1344_p13 = scmp.lt.u32.totalorder %s1340_s17, %s1814_s4 }
  0x5b   :  { %p1346_p0 = pnand %p1344_p13, %p1341_p12 }
  0x5d   :  { %1349 = shalt.err (!%p1346_p0)
}
  0x5e   :  { %s1350_s20 = scalar_lea.vmem %s1568_s26, 512  ;;  %p1355_p2 = scmp.lt.s32.totalorder %s1568_s26, %s1568_s26 }
  0x5f   :  { %p1351_p1 = scmp.ne.s32.totalorder %s1568_s26, %s1350_s20  ;;  %p1356_p3 = scmp.lt.s32.totalorder %s1350_s20, %s1350_s20 }
  0x61   :  { %p1357_p4 = por %p1356_p3, %p1355_p2 }
  0x63   :  { %p1358_p5 = pnand %p1357_p4, %p1351_p1 }
  0x65   :  { %1361 = shalt.err (!%p1358_p5)
}
  0x66   :  { %74 = dma.hbm_to_vmem [thread:$0]  %s1814_s4, 512, %s1568_s26, [#allocation9], %s1446_s16, %s1446_s16, %s1447_s30  }
  0x67   :  { %s1450_s24 = smov [#allocation13]   ;;  %s1451_s27 = smov [#allocation14]  }
  0x68   :  { %s94_s25 = sshll.u32 %s1450_s24, 4  ;;  %s106_s28 = sshll.u32 %s1451_s27, 4  ;;  %s95_s25 = int_to_ptr.vmem [resolvable:$true] %s94_s25  ;;  %s1602_s28 = int_to_ptr.vmem [resolvable:$true] %s106_s28 }
  0x69   :  { %s1362_s11 = scalar_lea.hbm %s1817_s7, 1024 }
  0x6a   :  { %p1363_p6 = scmp.ne.s32.totalorder %s1817_s7, %s1362_s11  ;;  %p1366_p7 = scmp.lt.u32.totalorder %s1362_s11, %s1817_s7 }
  0x6c   :  { %p1368_p8 = pnand %p1366_p7, %p1363_p6 }
  0x6e   :  { %1371 = shalt.err (!%p1368_p8)
}
  0x6f   :  { %s1372_s4 = scalar_lea.vmem %s95_s25, 1024  ;;  %p1377_p10 = scmp.lt.s32.totalorder %s95_s25, %s95_s25 }
  0x70   :  { %p1373_p9 = scmp.ne.s32.totalorder %s95_s25, %s1372_s4  ;;  %p1378_p11 = scmp.lt.s32.totalorder %s1372_s4, %s1372_s4 }
  0x72   :  { %p1379_p12 = por %p1378_p11, %p1377_p10 }
  0x74   :  { %p1380_p13 = pnand %p1379_p12, %p1373_p9 }
  0x76   :  { %1383 = shalt.err (!%p1380_p13)
}
  0x77   :  { %100 = dma.hbm_to_vmem [thread:$0]  %s1817_s7, 1024, %s95_s25, [#allocation12], %s1446_s16, %s1446_s16, %s1447_s30  }
  0x78   :  { %s1384_s17 = scalar_lea.hbm %s1818_s8, 1024 }
  0x79   :  { %p1385_p0 = scmp.ne.s32.totalorder %s1818_s8, %s1384_s17  ;;  %p1388_p1 = scmp.lt.u32.totalorder %s1384_s17, %s1818_s8 }
  0x7b   :  { %p1390_p2 = pnand %p1388_p1, %p1385_p0 }
  0x7d   :  { %1393 = shalt.err (!%p1390_p2)
}
  0x7e   :  { %s1394_s20 = scalar_lea.vmem %s1602_s28, 1024  ;;  %p1399_p4 = scmp.lt.s32.totalorder %s1602_s28, %s1602_s28 }
  0x7f   :  { %p1395_p3 = scmp.ne.s32.totalorder %s1602_s28, %s1394_s20  ;;  %p1400_p5 = scmp.lt.s32.totalorder %s1394_s20, %s1394_s20 }
  0x81   :  { %p1401_p6 = por %p1400_p5, %p1399_p4 }
  0x83   :  { %p1402_p7 = pnand %p1401_p6, %p1395_p3 }
  0x85   :  { %1405 = shalt.err (!%p1402_p7)
}
  0x86   :  { %112 = dma.hbm_to_vmem [thread:$0]  %s1818_s8, 1024, %s1602_s28, [#allocation15], %s1446_s16, %s1446_s16, %s1447_s30  }
  0x87   :  { %1428 = dma.done.wait [#allocation3], 128  }
  0x88   :  { %1429 = vsyncadd [#allocation3], 4294967168 }
  0x89   :  { %1430 = dma.done.wait [#allocation6], 256  }
  0x8a   :  { %1431 = vsyncadd [#allocation6], 4294967040 }
  0x8b   :  { %1432 = dma.done.wait [#allocation9], 1536  }
  0x8c   :  { %1433 = vsyncadd [#allocation9], 4294965760 }
  0x8d   :  { %1434 = dma.done.wait [#allocation12], 2048  }
  0x8e   :  { %1435 = vsyncadd [#allocation12], 4294965248 }
  0x8f   :  { %1436 = dma.done.wait [#allocation15], 1024  }
  0x90   :  { %1437 = vsyncadd [#allocation15], 4294966272  ;;  %v1452_v0 = vmov 0.0   ;;  %vm1453_vm0 = vmmov 0   ;;  %v1180_v1 = vld [vmem:[#allocation10] sm:$0xff]   ;;  %v1181_v2 = vld [vmem:[#allocation10 + $0x8] sm:$0xff]  }
  0x91   :  { %1080 = vmatprep.subr.bf16.mxu1 %v1452_v0  ;;  %1088 = vmatprep.mubr.msk.bf16.mxu1 %vm1453_vm0, %v1452_v0  ;;  %vm405_vm1 = vcmask 261120   ;;  %v1182_v3 = vld [vmem:[#allocation10 + $0x10] sm:$0xff]   ;;  %v1646_v4 = vld [vmem:[#allocation2] sm:$0xff]  ;;  %v397_v5 = vld [vmem:[#allocation8] sm:$0xff]  ;;  %vm179_vm2 = vcmask 523264   ;;  %vm478_vm3 = vcmask 1041409  }
  0x92   :  { %1112 = vmatprep.subr.bf16.mxu0 %v1452_v0  ;;  %1118 = vmatprep.mubr.msk.bf16.mxu0 %vm1453_vm0, %v1452_v0  ;;  %v398_v6 = vld [vmem:[#allocation8 + $0x8] sm:$0xff]  ;;  %v399_v7 = vld [vmem:[#allocation8 + $0x10] sm:$0xff]  ;;  %v400_v8 = vld [vmem:[#allocation8 + $0x18] sm:$0xff]  ;;  %v406_v10 = vsel %vm405_vm1, %v397_v5, -inf  ;;  %v142_v12 = vpack.c.bf16 %v1646_v4, %v1646_v4  ;;  %vm480_vm4 = vcmask 1042434   ;;  %vm482_vm5 = vcmask 1043459  }
  0x93   :  { %1081 = vmatpush3.bf16.msra.mxu1 %v1180_v1  ;;  %v401_v9 = vld [vmem:[#allocation8 + $0x20] sm:$0xff]  ;;  %v413_v11 = vsel %vm405_vm1, %v398_v6, -inf  ;;  %v402_v13 = vld [vmem:[#allocation8 + $0x28] sm:$0xff]  ;;  %v403_v14 = vld [vmem:[#allocation8 + $0x30] sm:$0xff]  ;;  %v407_v16 = vrot.slane %v406_v10, 4  ;;  %v420_v18 = vsel %vm405_vm1, %v399_v7, -inf }
  0x94   :  { %1082 = vmatprep.subr.bf16.mxu1 %v1452_v0  ;;  %v404_v15 = vld [vmem:[#allocation8 + $0x38] sm:$0xff]  ;;  %v414_v17 = vrot.slane %v413_v11, 4  ;;  %v421_v19 = vrot.slane %v420_v18, 4  ;;  %v427_v20 = vsel %vm405_vm1, %v400_v8, -inf  ;;  %v434_v21 = vsel %vm405_vm1, %v401_v9, -inf  ;;  %v1668_v1 = vld [vmem:[#allocation5] sm:$0xff] }
  0x95   :  { %v441_v22 = vsel %vm405_vm1, %v402_v13, -inf  ;;  %v408_v23 = vmax.f32 %v406_v10, %v407_v16  ;;  %v428_v25 = vrot.slane %v427_v20, 4  ;;  %v435_v26 = vrot.slane %v434_v21, 4  ;;  %v1183_v27 = vld [vmem:[#allocation10 + $0x18] sm:$0xff]  }
  0x96   :  { %v415_v24 = vmax.f32 %v413_v11, %v414_v17  ;;  %v422_v28 = vmax.f32 %v420_v18, %v421_v19  ;;  %v442_v29 = vrot.slane %v441_v22, 4  ;;  %v448_v30 = vsel %vm405_vm1, %v403_v14, -inf  ;;  %v389_v18 = vld [vmem:[#allocation7] sm:$0xff] }
  0x97   :  { %1083 = vmatpush3.bf16.msra.mxu1 %v1181_v2  ;;  %v455_v31 = vsel %vm405_vm1, %v404_v15, -inf  ;;  %v409_v32 = vrot.slane %v408_v23, 2  ;;  %v429_v34 = vmax.f32 %v427_v20, %v428_v25  ;;  %v436_v35 = vmax.f32 %v434_v21, %v435_v26 }
  0x98   :  { %1084 = vmatprep.subr.bf16.mxu1 %v1452_v0  ;;  %v416_v33 = vrot.slane %v415_v24, 2  ;;  %v423_v36 = vrot.slane %v422_v28, 2  ;;  %v443_v37 = vmax.f32 %v441_v22, %v442_v29  ;;  %v449_v38 = vrot.slane %v448_v30, 4 }
  0x99   :  { %v456_v39 = vrot.slane %v455_v31, 4  ;;  %v410_v40 = vmax.f32 %v408_v23, %v409_v32  ;;  %v430_v42 = vrot.slane %v429_v34, 2  ;;  %v437_v43 = vrot.slane %v436_v35, 2  ;;  %v1186_v32 = vld [vmem:[#allocation11 + $0x8] sm:$0xff]  }
  0x9a   :  { %v417_v41 = vmax.f32 %v415_v24, %v416_v33  ;;  %vm484_vm6 = vcmask 1044484   ;;  %v424_v44 = vmax.f32 %v422_v28, %v423_v36  ;;  %v444_v45 = vrot.slane %v443_v37, 2  ;;  %v1187_v33 = vld [vmem:[#allocation13 + $0x20] sm:$0xff]   ;;  %v1190_v36 = vld [vmem:[#allocation11 + $0x18] sm:$0xff]  }
  0x9b   :  { %1085 = vmatpush3.bf16.msra.mxu1 %v1182_v3  ;;  %v450_v46 = vmax.f32 %v448_v30, %v449_v38  ;;  %v457_v47 = vmax.f32 %v455_v31, %v456_v39  ;;  %vm486_vm7 = vcmask 1045509   ;;  %v411_v48 = vrot.slane %v410_v40, 1  ;;  %v1184_v30 = vld [vmem:[#allocation11] sm:$0xff]   ;;  %v1185_v31 = vld [vmem:[#allocation13 + $0x18] sm:$0xff]   ;;  %v1194_v38 = vld [vmem:[#allocation11 + $0x28] sm:$0xff]  }
  0x9c   :  { %1086 = vmatprep.subr.bf16.mxu1 %v1452_v0  ;;  %v418_v49 = vrot.slane %v417_v41, 1  ;;  %v431_v50 = vmax.f32 %v429_v34, %v430_v42  ;;  %v438_v51 = vmax.f32 %v436_v35, %v437_v43  ;;  %vm488_vm8 = vcmask 1046534   ;;  %1113 = vmatpush3.bf16.msra.mxu0 %v1185_v31  ;;  %v1188_v34 = vld [vmem:[#allocation11 + $0x10] sm:$0xff]   ;;  %v1189_v35 = vld [vmem:[#allocation13 + $0x28] sm:$0xff]  }
  0x9d   :  { %v425_v52 = vrot.slane %v424_v44, 1  ;;  %v445_v53 = vmax.f32 %v443_v37, %v444_v45  ;;  %v451_v54 = vrot.slane %v450_v46, 2  ;;  %v458_v55 = vrot.slane %v457_v47, 2  ;;  %1114 = vmatprep.subr.bf16.mxu0 %v1452_v0  ;;  %v1192_v37 = vld [vmem:[#allocation11 + $0x20] sm:$0xff]   ;;  %v1196_v39 = vld [vmem:[#allocation11 + $0x30] sm:$0xff]  }
  0x9e   :  { %vm490_vm9 = vcmask 1047559   ;;  %v1661_v56 = vmax.f32 %v410_v40, %v411_v48  ;;  %v1663_v57 = vmax.f32 %v417_v41, %v418_v49  ;;  %v432_v58 = vrot.slane %v431_v50, 1  ;;  %v1197_v40 = vld [vmem:[#allocation11 + $0x38] sm:$0xff]   ;;  %v1191_v49 = vld [vmem:[#allocation13] sm:$0xff]  }
  0x9f   :  { %1087 = vmatpush3.bf16.msra.mxu1 %v1183_v27  ;;  %v439_v59 = vrot.slane %v438_v51, 1  ;;  %v1666_v60 = vmax.f32 %v424_v44, %v425_v52  ;;  %v446_v61 = vrot.slane %v445_v53, 1  ;;  %v452_v62 = vmax.f32 %v450_v46, %v451_v54  ;;  %v1193_v52 = vld [vmem:[#allocation13 + $0x8] sm:$0xff]  }
  0xa0   :  { %1092 = vmatprep.subr.bf16.mxu1 %v1452_v0  ;;  %v459_v63 = vmax.f32 %v457_v47, %v458_v55  ;;  %v1670_v2 = vmax.f32 %v431_v50, %v432_v58  ;;  %v462_v4 = vmul.f32 %v1661_v56, %v1661_v56  ;;  %v463_v5 = vmul.f32 %v1663_v57, %v1663_v57  ;;  %v1195_v55 = vld [vmem:[#allocation13 + $0x10] sm:$0xff]  }
  0xa1   :  { %v1672_v3 = vmax.f32 %v438_v51, %v439_v59  ;;  %v1680_v6 = vmax.f32 %v445_v53, %v446_v61  ;;  %v453_v7 = vrot.slane %v452_v62, 1  ;;  %v464_v9 = vmul.f32 %v1666_v60, %v1666_v60  ;;  %1115 = vmatpush3.bf16.msra.mxu0 %v1187_v33  ;;  %v1200_v61 = vld [vmem:[#allocation14] sm:$0xff]   ;;  %v1749_v33 = vld [vmem:[%s1816_s6] sm:$0xf] }
  0xa2   :  { %1089 = vmatmul.mubr.msk.bf16.vlgmr.msra.gmra.mrb[0].mxu1 %vm179_vm2, %v142_v12  ;;  %v460_v8 = vrot.slane %v459_v63, 1  ;;  %v465_v10 = vmul.f32 %v1670_v2, %v1670_v2  ;;  %v479_v12 = vsel %vm478_vm3, %v463_v5, %v462_v4  ;;  %vm382_vm10 = vcmask 392192   ;;  %1116 = vmatprep.subr.bf16.mxu0 %v1452_v0  ;;  %v1201_v5 = vld [vmem:[#allocation14 + $0x8] sm:$0xff]  }
  0xa3   :  { %1108 = vmatprep.mubr.msk.bf16.mxu1 %vm1453_vm0, %v1452_v0  ;;  %v466_v11 = vmul.f32 %v1672_v3, %v1672_v3  ;;  %v1689_v13 = vmax.f32 %v452_v62, %v453_v7  ;;  %v467_v15 = vmul.f32 %v1680_v6, %v1680_v6  ;;  %v481_v16 = vsel %vm480_vm4, %v464_v9, %v479_v12 }
  0xa4   :  { %v1691_v14 = vmax.f32 %v459_v63, %v460_v8  ;;  %v483_v17 = vsel %vm482_vm5, %v465_v10, %v481_v16  ;;  %v381_v19 = vmul.f32 %v1668_v1, %v1668_v1  ;;  %v390_v26 = vmul.f32 %v389_v18, %v389_v18  ;;  %1093 = vmatpush3.bf16.msra.mxu1 %v1184_v30 }
  0xa5   :  { %v468_v20 = vmul.f32 %v1689_v13, %v1689_v13  ;;  %v485_v22 = vsel %vm484_vm6, %v466_v11, %v483_v17  ;;  %1094 = vmatprep.subr.bf16.mxu1 %v1452_v0  ;;  %1117 = vmatpush3.bf16.msra.mxu0 %v1189_v35  ;;  %vm989_vm11 = vcmask 64512  }
  0xa6   :  { %v469_v21 = vmul.f32 %v1691_v14, %v1691_v14  ;;  %v487_v23 = vsel %vm486_vm7, %v467_v15, %v485_v22  ;;  %v383_v24 = vsel %vm382_vm10, %v381_v19, 0.0  ;;  %v391_v29 = vsel %vm382_vm10, %v390_v26, 0.0  ;;  %1122 = vmatprep.subr.bf16.mxu0 %v1452_v0 }
  0xa7   :  { %v489_v25 = vsel %vm488_vm8, %v468_v20, %v487_v23  ;;  %384 = vadd.xlane.f32.xlu1 %v383_v24 }
  0xa8   :  { %v491_v27 = vsel %vm490_vm9, %v469_v21, %v489_v25  ;;  %1095 = vmatpush3.bf16.msra.mxu1 %v1186_v32 }
  0xa9   :  { %v493_v28 = vsel %vm405_vm1, %v491_v27, 0.0  ;;  %1096 = vmatprep.subr.bf16.mxu1 %v1452_v0 }
  0xaa   :  { %494 = vadd.xlane.f32.xlu0 %v493_v28 }
  0xac   :  { %1097 = vmatpush3.bf16.msra.mxu1 %v1188_v34 }
  0xad   :  { %1098 = vmatprep.subr.bf16.mxu1 %v1452_v0 }
  0xae   :  { %392 = vadd.xlane.f32.xlu0 %v391_v29 }
  0xb0   :  { %1099 = vmatpush3.bf16.msra.mxu1 %v1190_v36 }
  0xb1   :  { %1100 = vmatprep.subr.bf16.mxu1 %v1452_v0 }
  0xb4   :  { %1101 = vmatpush3.bf16.msra.mxu1 %v1192_v37 }
  0xb5   :  { %1102 = vmatprep.subr.bf16.mxu1 %v1452_v0 }
  0xb8   :  { %1103 = vmatpush3.bf16.msra.mxu1 %v1194_v38 }
  0xb9   :  { %1104 = vmatprep.subr.bf16.mxu1 %v1452_v0 }
  0xbc   :  { %1105 = vmatpush3.bf16.msra.mxu1 %v1196_v39 }
  0xbd   :  { %1106 = vmatprep.subr.bf16.mxu1 %v1452_v0 }
  0xc0   :  { %1107 = vmatpush3.bf16.msra.mxu1 %v1197_v40 }
  0xc1   :  { %1132 = vmatprep.subr.bf16.mxu1 %v1452_v0 }
 0x134   :  { %v385_v44 = vpop.xlane.xlu1 %384 }
 0x135   :  { %v386_v45 = vmax.f32 %v385_v44, 1e-24 }
 0x137   :  { %v495_v41 = vpop.xlane.xlu0 %494 }
 0x138   :  { %v496_v46 = vmax.f32 %v495_v41, 1e-24 }
 0x13b   :  { %v393_v42 = vpop.xlane.xlu0 %392 }
 0x13c   :  { %v394_v43 = vmax.f32 %v393_v42, 1e-24 }
 0x13e   :  { %1208 = vrsqrt.f32 %v394_v43 }
 0x13f   :  { %1210 = vrsqrt.f32 %v386_v45 }
 0x140   :  { %1212 = vrsqrt.f32 %v496_v46  ;;  %v1198_v46 = vld [vmem:[#allocation13 + $0x30] sm:$0xff]  }
 0x148   :  { %v1209_v47 = vpop.eup %1208 }
 0x149   :  { %v396_v48 = vmul.f32 %v1209_v47, %v389_v18  ;;  %v1211_v51 = vpop.eup %1210  ;;  %v151_v18 = vlaneseq }
 0x14a   :  { %v1213_v53 = vpop.eup %1212  ;;  %v388_v54 = vmul.f32 %v1211_v51, %v1668_v1 }
 0x14b   :  { %v540_v50 = vpack.c.bf16 %v396_v48, %v396_v48  ;;  %v499_v58 = vrot.slane %v1213_v53, 1  ;;  %v500_v62 = vrot.slane %v1213_v53, 2  ;;  %v501_v4 = vrot.slane %v1213_v53, 3 }
 0x14c   :  { %v539_v59 = vpack.c.bf16 %v388_v54, %v388_v54  ;;  %v514_v7 = vmul.f32 %v1213_v53, %v1661_v56  ;;  %v502_v9 = vrot.slane %v1213_v53, 4  ;;  %v503_v11 = vrot.slane %v1213_v53, 5 }
 0x14d   :  { %1119 = vmatmul.mubr.msk.bf16.vlgmr.msra.gmra.mrb[0].mxu0 %vm382_vm10, %v540_v50  ;;  %v515_v63 = vmul.f32 %v499_v58, %v1663_v57  ;;  %v516_v1 = vmul.f32 %v500_v62, %v1666_v60  ;;  %v517_v10 = vmul.f32 %v501_v4, %v1670_v2  ;;  %v504_v60 = vrot.slane %v1213_v53, 6  ;;  %v1203_v58 = vld [vmem:[#allocation14 + $0x18] sm:$0xff]   ;;  %v1206_v62 = vld [vmem:[#allocation14 + $0x30] sm:$0xff]  }
 0x14e   :  { %1123 = vmatpush3.bf16.msra.mxu0 %v1191_v49  ;;  %1128 = vmatprep.mubr.msk.bf16.mxu0 %vm1453_vm0, %v1452_v0  ;;  %v663_v12 = vpack.c.bf16 %v514_v7, %v514_v7  ;;  %v518_v16 = vmul.f32 %v502_v9, %v1672_v3  ;;  %v519_v20 = vmul.f32 %v503_v11, %v1680_v6  ;;  %v505_v23 = vrot.slane %v1213_v53, 7 }
 0x14f   :  { %1124 = vmatprep.subr.bf16.mxu0 %v1452_v0  ;;  %v664_v8 = vpack.c.bf16 %v515_v63, %v515_v63  ;;  %v665_v57 = vpack.c.bf16 %v516_v1, %v516_v1  ;;  %v666_v17 = vpack.c.bf16 %v517_v10, %v517_v10  ;;  %v1739_v24 = vshrl.u32 %v151_v18, 7  ;;  %v1207_v63 = vld [vmem:[#allocation14 + $0x38] sm:$0xff]  }
 0x150   :  { %v679_v56 = vunpack.c.l.b16 %v663_v12  ;;  %v667_v22 = vpack.c.bf16 %v518_v16, %v518_v16  ;;  %v520_v25 = vmul.f32 %v504_v60, %v1689_v13  ;;  %v668_v27 = vpack.c.bf16 %v519_v20, %v519_v20  ;;  %v1780_v20 = vld [vmem:[%s1819_s9] sm:$0xf]  ;;  %s1454_s9 = smov [#allocation16]  }
 0x151   :  { %v680_v15 = vunpack.c.l.b16 %v664_v8  ;;  %v681_v19 = vunpack.c.l.b16 %v665_v57  ;;  %v682_v2 = vunpack.c.l.b16 %v666_v17  ;;  %v521_v29 = vmul.f32 %v505_v23, %v1691_v14  ;;  %s997_s23 = sshll.u32 %s1454_s9, 4  ;;  %s998_s23 = int_to_ptr.vmem [resolvable:$true] %s997_s23 }
 0x152   :  { %1125 = vmatpush3.bf16.msra.mxu0 %v1193_v52  ;;  %v683_v3 = vunpack.c.l.b16 %v667_v22  ;;  %v153_v31 = vsub.s32 0, %v1739_v24  ;;  %v669_v6 = vpack.c.bf16 %v520_v25, %v520_v25  ;;  %v684_v34 = vunpack.c.l.b16 %v668_v27  ;;  %v1199_v52 = vld [vmem:[#allocation13 + $0x38] sm:$0xff]   ;;  %s1406_s24 = scalar_lea.vmem %s998_s23, 128  ;;  %p1411_p9 = scmp.lt.s32.totalorder %s998_s23, %s998_s23 }
 0x153   :  { %1126 = vmatprep.subr.bf16.mxu0 %v1452_v0  ;;  %v687_v21 = vrot.slane %v680_v15, 7  ;;  %v689_v26 = vrot.slane %v681_v19, 6  ;;  %v691_v30 = vrot.slane %v682_v2, 5  ;;  %v670_v35 = vpack.c.bf16 %v521_v29, %v521_v29  ;;  %p1407_p8 = scmp.ne.s32.totalorder %s998_s23, %s1406_s24  ;;  %p1412_p10 = scmp.lt.s32.totalorder %s1406_s24, %s1406_s24 }
 0x154   :  { %v693_v13 = vrot.slane %v683_v3, 4  ;;  %v154_v14 = vrot.slane %v1749_v33, %v153_v31  ;;  %v685_v37 = vunpack.c.l.b16 %v669_v6  ;;  %v695_v38 = vrot.slane %v684_v34, 3 }
 0x155   :  { %v688_v28 = vsel %vm478_vm3, %v687_v21, %v679_v56  ;;  %v686_v41 = vunpack.c.l.b16 %v670_v35  ;;  %v242_v12 = vsub.s32 1, %v1739_v24  ;;  %v761_v22 = vrot.slane %v1780_v20, %v153_v31  ;;  %p1413_p11 = por %p1412_p10, %p1411_p9 }
 0x156   :  { %1127 = vmatpush3.bf16.msra.mxu0 %v1195_v55  ;;  %v690_v32 = vsel %vm480_vm4, %v689_v26, %v688_v28  ;;  %v697_v44 = vrot.slane %v685_v37, 2  ;;  %v1202_v55 = vld [vmem:[#allocation14 + $0x10] sm:$0xff]  }
 0x157   :  { %1140 = vmatprep.subr.bf16.mxu0 %v1452_v0  ;;  %v692_v36 = vsel %vm482_vm5, %v691_v30, %v690_v32  ;;  %v699_v50 = vrot.slane %v686_v41, 1  ;;  %v243_v15 = vrot.slane %v1749_v33, %v242_v12  ;;  %p1414_p12 = pnand %p1413_p11, %p1407_p8 }
 0x158   :  { %v694_v39 = vsel %vm484_vm6, %v693_v13, %v692_v36 }
 0x159   :  { %1129 = vmatmul.mubr.msk.bf16.vlgmr.msra.gmra.mrb[4].mxu0 %vm382_vm10, %v539_v59  ;;  %v696_v47 = vsel %vm486_vm7, %v695_v38, %v694_v39  ;;  %v1204_v59 = vld [vmem:[#allocation14 + $0x20] sm:$0xff]  }
 0x15a   :  { %1141 = vmatpush3.bf16.msra.mxu0 %v1200_v61  ;;  %1156 = vmatprep.mubr.msk.bf16.mxu0 %vm1453_vm0, %v1452_v0  ;;  %v698_v51 = vsel %vm488_vm8, %v697_v44, %v696_v47  ;;  %v1205_v61 = vld [vmem:[#allocation14 + $0x28] sm:$0xff]   ;;  %v359_v44 = vsub.s32 2, %v1739_v24 }
 0x15b   :  { %1142 = vmatprep.subr.bf16.mxu0 %v1452_v0  ;;  %v700_v53 = vsel %vm490_vm9, %v699_v50, %v698_v51 }
 0x15c   :  { %v701_v54 = vpack.c.b16 %v700_v53, %v700_v53 }
 0x15e   :  { %1143 = vmatpush3.bf16.msra.mxu0 %v1201_v5 }
 0x15f   :  { %1144 = vmatprep.subr.bf16.mxu0 %v1452_v0 }
 0x162   :  { %1145 = vmatpush3.bf16.msra.mxu0 %v1202_v55 }
 0x163   :  { %1146 = vmatprep.subr.bf16.mxu0 %v1452_v0 }
 0x166   :  { %1147 = vmatpush3.bf16.msra.mxu0 %v1203_v58 }
 0x167   :  { %1148 = vmatprep.subr.bf16.mxu0 %v1452_v0 }
 0x16a   :  { %1149 = vmatpush3.bf16.msra.mxu0 %v1204_v59 }
 0x16b   :  { %1150 = vmatprep.subr.bf16.mxu0 %v1452_v0 }
 0x16e   :  { %1151 = vmatpush3.bf16.msra.mxu0 %v1205_v61 }
 0x16f   :  { %1152 = vmatprep.subr.bf16.mxu0 %v1452_v0 }
 0x172   :  { %1153 = vmatpush3.bf16.msra.mxu0 %v1206_v62  ;;  %v783_v62 = vrot.slane %v1780_v20, %v242_v12 }
 0x173   :  { %1154 = vmatprep.subr.bf16.mxu0 %v1452_v0 }
 0x175   :  { %v217_v40 = vpop.f32.mrb[0].mxu1 }
 0x176   :  { %v1756_v42 = vadd.f32 %v217_v40, %v154_v14  ;;  %v1090_v43 = vpop.f32.mrb[1].mxu1  ;;  %1155 = vmatpush3.bf16.msra.mxu0 %v1207_v63 }
 0x177   :  { %v220_v45 = vpop.f32.mrb[2].mxu1 }
 0x178   :  { %v239_v48 = vpack.c.bf16 %v1756_v42, %v1756_v42  ;;  %v1091_v49 = vpop.f32.mrb[3].mxu1 }
 0x17a   :  { %1109 = vmatmul.mubr.bf16.vlgmr.msra.gmra.mrb[4].mxu1 %v239_v48  ;;  %v364_v48 = vsub.s32 3, %v1739_v24 }
 0x17b   :  { %1133 = vmatpush3.bf16.msra.mxu1 %v1198_v46  ;;  %1136 = vmatprep.mubr.msk.bf16.mxu1 %vm1453_vm0, %v1452_v0 }
 0x17c   :  { %1134 = vmatprep.subr.bf16.mxu1 %v1452_v0 }
 0x17f   :  { %1135 = vmatpush3.bf16.msra.mxu1 %v1199_v52 }
 0x180   :  { %1160 = vmatprep.subr.mxu1 %v1452_v0 }
 0x182   :  { %1137 = vmatmul.mubr.msk.bf16.vlgmr.msra.gmra.mrb[8].mxu1 %vm405_vm1, %v701_v54 }
 0x183   :  { %1162 = vmatprep.mubr.msk.f32.mxu1 %vm1453_vm0, %v1452_v0 }
 0x220   :  { %v596_v4 = vpop.f32.mrb[0].mxu0 }
 0x221   :  { %v1120_v5 = vpop.f32.mrb[1].mxu0 }
 0x222   :  { %v599_v1 = vpop.f32.mrb[2].mxu0 }
 0x223   :  { %v1121_v7 = vpop.f32.mrb[3].mxu0 }
 0x22c   :  { %v657_v8 = vpop.f32.mrb[4].mxu0 }
 0x22d   :  { %v658_v9 = vadd.f32 %v657_v8, %v596_v4  ;;  %v1130_v10 = vpop.f32.mrb[5].mxu0 }
 0x22e   :  { %v660_v57 = vpop.f32.mrb[6].mxu0 }
 0x22f   :  { %v1131_v11 = vpop.f32.mrb[7].mxu0 }
 0x24d   :  { %v326_v16 = vpop.f32.mrb[4].mxu1 }
 0x24e   :  { %v327_v17 = vadd.f32 %v326_v16, %v243_v15  ;;  %v1110_v18 = vpop.f32.mrb[5].mxu1 }
 0x24f   :  { %v329_v60 = vpop.f32.mrb[6].mxu1 }
 0x250   :  { %v332_v0 = vrot.slane %v327_v17, 4  ;;  %v1111_v19 = vpop.f32.mrb[7].mxu1 }
 0x252   :  { %v333_v56 = vadd.f32 %v332_v0, %v327_v17 }
 0x254   :  { %v334_v21 = vrot.slane %v333_v56, 2 }
 0x255   :  { %v751_v23 = vpop.f32.mrb[8].mxu1 }
 0x256   :  { %v335_v2 = vadd.f32 %v334_v21, %v333_v56  ;;  %v757_v25 = vadd.f32 %v751_v23, %v658_v9  ;;  %v1138_v26 = vpop.f32.mrb[9].mxu1 }
 0x257   :  { %v754_v27 = vpop.f32.mrb[10].mxu1 }
 0x258   :  { %v336_v28 = vrot.slane %v335_v2, 1  ;;  %v1785_v3 = vadd.f32 %v761_v22, %v757_v25  ;;  %v1139_v29 = vpop.f32.mrb[11].mxu1 }
 0x25a   :  { %v337_v30 = vadd.f32 %v336_v28, %v335_v2  ;;  %v779_v6 = vpack.c.bf16 %v1785_v3, %v1785_v3 }
 0x25c   :  { %v339_v32 = vmul.f32 0.125, %v337_v30  ;;  %1157 = vmatmul.mubr.bf16.vlgmr.msra.gmra.mrb[8].mxu0 %v779_v6 }
 0x25e   :  { %v340_v34 = vsub.f32 %v327_v17, %v339_v32 }
 0x260   :  { %v341_v13 = vmul.f32 %v340_v34, %v340_v34 }
 0x262   :  { %v342_v35 = vrot.slane %v341_v13, 4 }
 0x264   :  { %v343_v36 = vadd.f32 %v342_v35, %v341_v13 }
 0x266   :  { %v344_v31 = vrot.slane %v343_v36, 2 }
 0x268   :  { %v345_v14 = vadd.f32 %v344_v31, %v343_v36 }
 0x26a   :  { %v346_v37 = vrot.slane %v345_v14, 1 }
 0x26c   :  { %v347_v38 = vadd.f32 %v346_v37, %v345_v14 }
 0x26e   :  { %v348_v39 = vmul.f32 0.125, %v347_v38 }
 0x270   :  { %v349_v40 = vadd.f32 1e-05, %v348_v39 }
 0x272   :  { %1214 = vrsqrt.f32 %v349_v40 }
 0x27c   :  { %v1215_v41 = vpop.eup %1214 }
 0x27d   :  { %v351_v43 = vmul.f32 %v1215_v41, %v1749_v33 }
 0x27f   :  { %v352_v45 = vmul.f32 %v351_v43, %v339_v32  ;;  %v360_v47 = vrot.slane %v351_v43, %v359_v44 }
 0x281   :  { %v354_v46 = vrot.slane %v352_v45, 7  ;;  %v361_v50 = vmul.f32 %v360_v47, %v327_v17 }
 0x283   :  { %v356_v49 = vsub.f32 %v1749_v33, %v354_v46 }
 0x285   :  { %v365_v51 = vrot.slane %v356_v49, %v364_v48 }
 0x287   :  { %v366_v52 = vadd.f32 %v365_v51, %v361_v50 }
 0x289   :  { %v1023_v53 = vmul.f32 -1.442695, %v366_v52 }
 0x28b   :  { %1216 = vpow2.f32 %v1023_v53 }
 0x295   :  { %v1217_v54 = vpop.eup %1216 }
 0x296   :  { %v370_v55 = vadd.f32 1.0, %v1217_v54 }
 0x298   :  { %1218 = vrcp.f32 %v370_v55 }
 0x2a2   :  { %v1219_v58 = vpop.eup %1218 }
 0x2a3   :  { %v373_v59 = vmul.f32 %v1219_v58, %v1756_v42 }
 0x2a5   :  { %v374_v61 = vmul.f32 %v373_v59, %v373_v59 }
 0x2a7   :  { %375 = vadd.xlane.f32.xlu0 %v374_v61 }
 0x32f   :  { %v866_v63 = vpop.f32.mrb[8].mxu0 }
 0x330   :  { %v867_v4 = vadd.f32 %v866_v63, %v783_v62  ;;  %v1158_v24 = vpop.f32.mrb[9].mxu0 }
 0x331   :  { %v869_v5 = vpop.f32.mrb[10].mxu0 }
 0x332   :  { %v872_v33 = vrot.slane %v867_v4, 4  ;;  %v1159_v1 = vpop.f32.mrb[11].mxu0 }
 0x334   :  { %v873_v7 = vadd.f32 %v872_v33, %v867_v4  ;;  %v376_v36 = vpop.xlane.xlu0 %375 }
 0x335   :  { %v377_v31 = vmax.f32 %v376_v36, 1e-24 }
 0x336   :  { %v874_v8 = vrot.slane %v873_v7, 2 }
 0x338   :  { %v875_v9 = vadd.f32 %v874_v8, %v873_v7 }
 0x33a   :  { %v876_v10 = vrot.slane %v875_v9, 1 }
 0x33c   :  { %v877_v57 = vadd.f32 %v876_v10, %v875_v9 }
 0x33e   :  { %v878_v11 = vmul.f32 0.125, %v877_v57 }
 0x340   :  { %v879_v15 = vsub.f32 %v867_v4, %v878_v11 }
 0x342   :  { %v880_v16 = vmul.f32 %v879_v15, %v879_v15 }
 0x344   :  { %v881_v17 = vrot.slane %v880_v16, 4 }
 0x346   :  { %v882_v42 = vadd.f32 %v881_v17, %v880_v16 }
 0x348   :  { %v883_v18 = vrot.slane %v882_v42, 2 }
 0x34a   :  { %v884_v60 = vadd.f32 %v883_v18, %v882_v42 }
 0x34c   :  { %v885_v0 = vrot.slane %v884_v60, 1 }
 0x34e   :  { %v886_v12 = vadd.f32 %v885_v0, %v884_v60 }
 0x350   :  { %v887_v19 = vmul.f32 0.125, %v886_v12 }
 0x352   :  { %v888_v56 = vadd.f32 1e-05, %v887_v19 }
 0x354   :  { %1220 = vrsqrt.f32 %v888_v56 }
 0x35e   :  { %v1221_v21 = vpop.eup %1220 }
 0x35f   :  { %v890_v22 = vmul.f32 %v1221_v21, %v1780_v20 }
 0x361   :  { %v891_v23 = vmul.f32 %v890_v22, %v878_v11  ;;  %v899_v25 = vrot.slane %v890_v22, %v359_v44 }
 0x363   :  { %v893_v2 = vrot.slane %v891_v23, 7  ;;  %v900_v27 = vmul.f32 %v899_v25, %v867_v4 }
 0x365   :  { %v895_v26 = vsub.f32 %v1780_v20, %v893_v2 }
 0x367   :  { %v904_v28 = vrot.slane %v895_v26, %v364_v48 }
 0x369   :  { %v905_v29 = vadd.f32 %v904_v28, %v900_v27 }
 0x36b   :  { %v1043_v30 = vmul.f32 -1.442695, %v905_v29 }
 0x36d   :  { %1222 = vpow2.f32 %v1043_v30 }
 0x377   :  { %v1223_v6 = vpop.eup %1222 }
 0x378   :  { %v909_v32 = vadd.f32 1.0, %v1223_v6 }
 0x37a   :  { %1224 = vrcp.f32 %v909_v32 }
 0x384   :  { %v1225_v34 = vpop.eup %1224 }
 0x385   :  { %v912_v13 = vmul.f32 %v1225_v34, %v1785_v3 }
 0x387   :  { %v913_v35 = vmul.f32 %v912_v13, %v912_v13 }
 0x389   :  { %914 = vadd.xlane.f32.xlu1 %v913_v35 }
 0x416   :  { %v915_v14 = vpop.xlane.xlu1 %914 }
 0x417   :  { %v916_v37 = vmax.f32 %v915_v14, 1e-24 }
 0x419   :  { %1226 = vrsqrt.f32 %v916_v37 }
 0x41a   :  { %1228 = vrsqrt.f32 %v377_v31 }
 0x423   :  { %v1227_v20 = vpop.eup %1226 }
 0x424   :  { %v1229_v38 = vpop.eup %1228  ;;  %v918_v39 = vmul.f32 %v1227_v20, %v912_v13 }
 0x425   :  { %v379_v40 = vmul.f32 %v1229_v38, %v373_v59 }
 0x426   :  { %1161 = vmatpush3.xpose.msra.mxu1 %v918_v39 }
 0x429   :  { %1163 = vmatmul.mubr.f32.vlgmr.msra.gmra.mrb[12].mxu1 %v379_v40 }
 0x4fc   :  { %v985_v41 = vpop.f32.mrb[12].mxu1 }
 0x4fd   :  { %v1164_v3 = vpop.f32.mrb[13].mxu1  ;;  %990 = vst.msk [vmem:[#allocation16] sm:$0xff] %vm989_vm11, %v985_v41 }
 0x4fe   :  { %1417 = shalt.err (!%p1414_p12)
}
 0x4ff   :  { %s1418_s28 = scalar_lea.hbm %s1820_s10, 128 }
 0x500   :  { %p1419_p13 = scmp.ne.s32.totalorder %s1820_s10, %s1418_s28  ;;  %p1422_p0 = scmp.lt.u32.totalorder %s1418_s28, %s1820_s10 }
 0x502   :  { %p1424_p1 = pnand %p1422_p0, %p1419_p13 }
 0x504   :  { %1427 = shalt.err (!%p1424_p1)
}
 0x505   :  { %1000 = dma.vmem_to_hbm [thread:$0]  %s998_s23, 128, %s1820_s10, [#allocation4]  }
 0x506   :  { %1438 = dma.done.wait [#allocation4], 128  }
 0x507   :  { %1439 = vsyncadd [#allocation4], 4294967168 }
 0x508   :  { %1004 = vsyncpa [#allocation3], 1 }
 0x509   :  { %1005 = vsyncpa [#allocation6], 1 }
 0x50a   :  { %1006 = vsyncpa [#allocation9], 1 }
 0x50b   :  { %1007 = vsyncpa [#allocation12], 1 }
 0x50c   :  { %1008 = vsyncpa [#allocation15], 1 }
 0x50d   :  { %1009 = vsyncpa [#allocation4], 1 }

</bundles_post_ra>
